<compile_context>
chip_gen: v7x
topology: tpu7x:2x2x1
jax: 0.10.0
libtpu: 0.0.40
codegen_flags: <defaults>
</compile_context>

<pallas_src>
import math
import jax
import jax.numpy as jnp
from jax.experimental import pallas as pl
from jax.experimental.pallas import tpu as pltpu

LANE = 128


def _round_up(n, m):
    return ((n + m - 1) // m) * m


def _choose_tb(B, tile_b):
    """Batch-tile size: multiple of 8, avoids mostly-padded last tiles, >=2 tiles when big."""
    B8 = _round_up(max(B, 1), 8)
    if B8 <= tile_b:
        # v7x megacore: give both TensorCores a tile once each half still has enough
        # rows (>= 256) to amortize the ~0.35 us per-grid-step overhead.
        if B8 >= 512:
            return _round_up(math.ceil(B8 / 2), 8)
        return B8
    n_tiles = math.ceil(B8 / tile_b)
    return _round_up(math.ceil(B8 / n_tiles), 8)


def mlp_kernel(x_ref, w1_ref, b1_ref, w2_ref, b2_ref, w3_ref, b3_ref, o_ref):
    """One batch tile: 2 bf16 MXU matmuls (f32 acc) + VPU/XLU final reduce + EUP sigmoid."""
    x = x_ref[...].astype(w1_ref.dtype)                                   # bf16 MXU operand
    h1 = jnp.dot(x, w1_ref[...], preferred_element_type=jnp.float32)      # [TB, Hp] f32 acc
    h1 = jnp.maximum(h1 + b1_ref[...], 0.0)                               # ReLU (VPU, f32)
    # Dropout(0.5) -> identity in eval mode
    h2 = jnp.dot(h1.astype(w2_ref.dtype), w2_ref[...],
                 preferred_element_type=jnp.float32)                      # [TB, Hp] f32 acc
    h2 = jnp.maximum(h2 + b2_ref[...], 0.0)                               # ReLU (VPU, f32)
    # Dropout(0.5) -> identity in eval mode
    # Final Linear(H -> 1): VPU multiply + XLU lane reduction instead of an N=1 MXU matmul.
    logits = jnp.sum(h2 * w3_ref[...], axis=-1, keepdims=True) + b3_ref[0]  # [TB, 1] f32
    o_ref[...] = jax.nn.sigmoid(logits)                                   # EUP exp path


def prepare_params(params, mxu_dtype=jnp.bfloat16):
    """One-time padding/casting of the weights (hoisted out of the per-call path).

    Hidden dim is zero-padded to a multiple of 128 (exact: padded units stay 0 through
    both ReLUs and the w3 reduce). Matmul weights are pre-cast to bf16 for the MXU;
    biases / w3 / b3 stay f32 for the VPU/EUP epilogue.
    """
    w1, b1, w2, b2, w3, b3 = params
    D, H = w1.shape
    Hp = _round_up(H, LANE)
    w1p = jnp.pad(w1, ((0, 0), (0, Hp - H))).astype(mxu_dtype)             # [D, Hp]
    b1p = jnp.pad(b1.reshape(1, H), ((0, 0), (0, Hp - H))).astype(jnp.float32)
    w2p = jnp.pad(w2, ((0, Hp - H), (0, Hp - H))).astype(mxu_dtype)        # [Hp, Hp]
    b2p = jnp.pad(b2.reshape(1, H), ((0, 0), (0, Hp - H))).astype(jnp.float32)
    w3row = jnp.pad(w3.reshape(1, H), ((0, 0), (0, Hp - H))).astype(jnp.float32)
    b3s = b3.reshape(1).astype(jnp.float32)                                # scalar -> SMEM
    return (w1p, b1p, w2p, b2p, w3row, b3s)


def fully_connected_nn(x, prepared_params, *, tile_b=1024):
    """Eval-mode forward of FullyConnectedNN via one batch-tiled pallas_call."""
    w1p, b1p, w2p, b2p, w3row, b3s = prepared_params
    B, D = x.shape
    Hp = w1p.shape[1]

    tb = _choose_tb(B, tile_b)
    Bp = _round_up(B, tb)
    xp = x if Bp == B else jnp.pad(x, ((0, Bp - B), (0, 0)))
    grid = (Bp // tb,)

    resident = lambda i: (0, 0)  # same block every step -> weights/biases stay VMEM-resident

    out = pl.pallas_call(
        mlp_kernel,
        out_shape=jax.ShapeDtypeStruct((Bp, 1), jnp.float32),
        grid=grid,
        in_specs=[
            pl.BlockSpec((tb, D), lambda i: (i, 0)),            # x rows, streamed
            pl.BlockSpec((D, Hp), resident),                    # W1 (bf16)
            pl.BlockSpec((1, Hp), resident),                    # b1 (f32)
            pl.BlockSpec((Hp, Hp), resident),                   # W2 (bf16)
            pl.BlockSpec((1, Hp), resident),                    # b2 (f32)
            pl.BlockSpec((1, Hp), resident),                    # W3 as a row (f32)
            pl.BlockSpec(memory_space=pltpu.MemorySpace.SMEM),  # b3 scalar in SMEM
        ],
        out_specs=pl.BlockSpec((tb, 1), lambda i: (i, 0)),      # narrow (Bp,1) output, no broadcast
        compiler_params=pltpu.CompilerParams(
            dimension_semantics=("parallel",),  # batch tiles independent -> v7x megacore sharding
        ),
    )(xp, w1p, b1p, w2p, b2p, w3row, b3s)

    return out[:B]


def init_linear_params(key, fan_in, fan_out):
    """Deterministic init matching torch.nn.Linear default: U(-1/sqrt(fan_in), 1/sqrt(fan_in))."""
    kw, kb = jax.random.split(key)
    bound = 1.0 / math.sqrt(fan_in)
    w = jax.random.uniform(kw, (fan_in, fan_out), jnp.float32, -bound, bound)
    b = jax.random.uniform(kb, (1, fan_out), jnp.float32, -bound, bound)
    return w, b


if __name__ == "__main__":
    input_dim = 16   # stands in for X_train.shape[1] (small synthetic choice)
    hidden_dim = 64
    batch = 8

    key = jax.random.PRNGKey(0)
    kx, k1, k2, k3 = jax.random.split(key, 4)

    x = jax.random.normal(kx, (batch, input_dim), jnp.float32)

    w1, b1 = init_linear_params(k1, input_dim, hidden_dim)
    w2, b2 = init_linear_params(k2, hidden_dim, hidden_dim)
    w3, b3 = init_linear_params(k3, hidden_dim, 1)
    params = (w1, b1, w2, b2, w3, b3)

    # One-time weight padding / bf16 casting (hoisted out of the per-call path).
    prepared = prepare_params(params)

    out = fully_connected_nn(x, prepared)
    out = jax.block_until_ready(out)

    # Plain-JAX f32 eval-mode reference (Dropout = identity). Kernel uses bf16 MXU
    # operands with f32 accumulate/epilogue, so tolerance is loosened accordingly.
    h1 = jnp.maximum(x @ w1 + b1, 0.0)
    h2 = jnp.maximum(h1 @ w2 + b2, 0.0)
    ref = jax.nn.sigmoid(h2 @ w3 + b3)

    assert out.shape == (batch, 1), out.shape
    assert jnp.allclose(out, ref, atol=2e-2, rtol=2e-2), "mismatch vs reference"

    print("KERNEL_OK")
</pallas_src>

<mosaic_0001>
module attributes {stable_mosaic.version = 11 : i64} {
  func.func @mlp_kernel(%arg0: i32, %arg1: memref<8x16xf32, #tpu.memory_space<vmem>>, %arg2: memref<16x128xbf16, #tpu.memory_space<vmem>>, %arg3: memref<1x128xf32, #tpu.memory_space<vmem>>, %arg4: memref<128x128xbf16, #tpu.memory_space<vmem>>, %arg5: memref<1x128xf32, #tpu.memory_space<vmem>>, %arg6: memref<1x128xf32, #tpu.memory_space<vmem>>, %arg7: memref<1xf32, #tpu.memory_space<smem>>, %arg8: memref<8x1xf32, #tpu.memory_space<vmem>>) attributes {dimension_semantics = [#tpu.dimension_semantics<parallel>], iteration_bounds = array<i64: 1>, scalar_prefetch = 0 : i64, scratch_operands = 0 : i64, tpu.core_type = #tpu.core_type<tc>, window_params = [{transform_indices = @transform_0, window_bounds = array<i64: 8, 16>}, {pipeline_mode = #tpu.pipeline_mode<synchronous>, transform_indices = @transform_1, window_bounds = array<i64: 16, 128>}, {pipeline_mode = #tpu.pipeline_mode<synchronous>, transform_indices = @transform_2, window_bounds = array<i64: 1, 128>}, {pipeline_mode = #tpu.pipeline_mode<synchronous>, transform_indices = @transform_3, window_bounds = array<i64: 128, 128>}, {pipeline_mode = #tpu.pipeline_mode<synchronous>, transform_indices = @transform_4, window_bounds = array<i64: 1, 128>}, {pipeline_mode = #tpu.pipeline_mode<synchronous>, transform_indices = @transform_5, window_bounds = array<i64: 1, 128>}, {transform_indices = @transform_6, window_bounds = array<i64: 1>}, {transform_indices = @transform_7, window_bounds = array<i64: 8, 1>}]} {
    %c0 = arith.constant 0 : index
    %c0_0 = arith.constant 0 : index
    %0 = vector.load %arg1[%c0, %c0_0] : memref<8x16xf32, #tpu.memory_space<vmem>>, vector<8x16xf32>
    %1 = arith.truncf %0 : vector<8x16xf32> to vector<8x16xbf16>
    %c0_1 = arith.constant 0 : index
    %c0_2 = arith.constant 0 : index
    %2 = vector.load %arg2[%c0_1, %c0_2] : memref<16x128xbf16, #tpu.memory_space<vmem>>, vector<16x128xbf16>
    %cst = arith.constant dense<0.000000e+00> : vector<8x128xf32>
    %3 = tpu.matmul %1, %2, %cst {dimension_numbers = #tpu.dot_dimension_numbers<[1], [0], [0], [1], [0, 0, 1, 1], [], []>} : vector<8x16xbf16>, vector<16x128xbf16>, vector<8x128xf32> -> vector<8x128xf32>
    %c0_3 = arith.constant 0 : index
    %c0_4 = arith.constant 0 : index
    %4 = vector.load %arg3[%c0_3, %c0_4] : memref<1x128xf32, #tpu.memory_space<vmem>>, vector<1x128xf32>
    %5 = vector.broadcast %4 : vector<1x128xf32> to vector<8x128xf32>
    %6 = arith.addf %3, %5 : vector<8x128xf32>
    %cst_5 = arith.constant 0.000000e+00 : f32
    %7 = vector.broadcast %cst_5 : f32 to vector<8x128xf32>
    %8 = arith.maximumf %6, %7 : vector<8x128xf32>
    %9 = arith.truncf %8 : vector<8x128xf32> to vector<8x128xbf16>
    %c0_6 = arith.constant 0 : index
    %c0_7 = arith.constant 0 : index
    %10 = vector.load %arg4[%c0_6, %c0_7] : memref<128x128xbf16, #tpu.memory_space<vmem>>, vector<128x128xbf16>
    %cst_8 = arith.constant dense<0.000000e+00> : vector<8x128xf32>
    %11 = tpu.matmul %9, %10, %cst_8 {dimension_numbers = #tpu.dot_dimension_numbers<[1], [0], [0], [1], [0, 0, 1, 1], [], []>} : vector<8x128xbf16>, vector<128x128xbf16>, vector<8x128xf32> -> vector<8x128xf32>
    %c0_9 = arith.constant 0 : index
    %c0_10 = arith.constant 0 : index
    %12 = vector.load %arg5[%c0_9, %c0_10] : memref<1x128xf32, #tpu.memory_space<vmem>>, vector<1x128xf32>
    %13 = vector.broadcast %12 : vector<1x128xf32> to vector<8x128xf32>
    %14 = arith.addf %11, %13 : vector<8x128xf32>
    %cst_11 = arith.constant 0.000000e+00 : f32
    %15 = vector.broadcast %cst_11 : f32 to vector<8x128xf32>
    %16 = arith.maximumf %14, %15 : vector<8x128xf32>
    %c0_12 = arith.constant 0 : index
    %c0_13 = arith.constant 0 : index
    %17 = vector.load %arg6[%c0_12, %c0_13] : memref<1x128xf32, #tpu.memory_space<vmem>>, vector<1x128xf32>
    %18 = vector.broadcast %17 : vector<1x128xf32> to vector<8x128xf32>
    %19 = arith.mulf %16, %18 : vector<8x128xf32>
    %cst_14 = arith.constant dense<0.000000e+00> : vector<8xf32>
    %20 = vector.multi_reduction <add>, %19, %cst_14 [1] : vector<8x128xf32> to vector<8xf32>
    %21 = vector.shape_cast %20 : vector<8xf32> to vector<8x1xf32>
    %c0_15 = arith.constant 0 : index
    %22 = memref.load %arg7[%c0_15] : memref<1xf32, #tpu.memory_space<smem>>
    %23 = vector.broadcast %22 : f32 to vector<8x1xf32>
    %24 = arith.addf %21, %23 : vector<8x1xf32>
    %25 = arith.negf %24 : vector<8x1xf32>
    %26 = math.exp %25 : vector<8x1xf32>
    %cst_16 = arith.constant 1.000000e+00 : f32
    %27 = vector.broadcast %cst_16 : f32 to vector<8x1xf32>
    %28 = arith.addf %27, %26 : vector<8x1xf32>
    %29 = arith.divf %27, %28 : vector<8x1xf32>
    %c0_17 = arith.constant 0 : index
    %c0_18 = arith.constant 0 : index
    %30 = vector.load %arg8[%c0_17, %c0_18] : memref<8x1xf32, #tpu.memory_space<vmem>>, vector<8x1xf32>
    tpu.vector_store %arg8[%c0_17, %c0_18], %29 {strides = array<i32>} : memref<8x1xf32, #tpu.memory_space<vmem>>, vector<8x1xf32>,
    return
  }
  func.func @transform_0(%arg0: i32) -> (i32, i32) {
    %c0_i32 = arith.constant 0 : i32
    %c0_i32_0 = arith.constant 0 : i32
    return %arg0, %c0_i32 : i32, i32
  }
  func.func @transform_1(%arg0: i32) -> (i32, i32) {
    %c0_i32 = arith.constant 0 : i32
    %c0_i32_0 = arith.constant 0 : i32
    %c0_i32_1 = arith.constant 0 : i32
    return %c0_i32, %c0_i32_0 : i32, i32
  }
  func.func @transform_2(%arg0: i32) -> (i32, i32) {
    %c0_i32 = arith.constant 0 : i32
    %c0_i32_0 = arith.constant 0 : i32
    %c0_i32_1 = arith.constant 0 : i32
    return %c0_i32, %c0_i32_0 : i32, i32
  }
  func.func @transform_3(%arg0: i32) -> (i32, i32) {
    %c0_i32 = arith.constant 0 : i32
    %c0_i32_0 = arith.constant 0 : i32
    %c0_i32_1 = arith.constant 0 : i32
    return %c0_i32, %c0_i32_0 : i32, i32
  }
  func.func @transform_4(%arg0: i32) -> (i32, i32) {
    %c0_i32 = arith.constant 0 : i32
    %c0_i32_0 = arith.constant 0 : i32
    %c0_i32_1 = arith.constant 0 : i32
    return %c0_i32, %c0_i32_0 : i32, i32
  }
  func.func @transform_5(%arg0: i32) -> (i32, i32) {
    %c0_i32 = arith.constant 0 : i32
    %c0_i32_0 = arith.constant 0 : i32
    %c0_i32_1 = arith.constant 0 : i32
    return %c0_i32, %c0_i32_0 : i32, i32
  }
  func.func @transform_6(%arg0: i32) -> i32 {
    %c0_i32 = arith.constant 0 : i32
    %c0_i32_0 = arith.constant 0 : i32
    return %c0_i32 : i32
  }
  func.func @transform_7(%arg0: i32) -> (i32, i32) {
    %c0_i32 = arith.constant 0 : i32
    %c0_i32_0 = arith.constant 0 : i32
    return %arg0, %c0_i32 : i32, i32
  }
}

</mosaic_0001>

<bundles_post_ra>
// kernel: tpu_custom_call.1
= control target key start
LH: loop header
LB: loop body
LE: loop exit
PB: predicated region body
PF: predicated region fallthrough
CT: control target
= control target key end

     0   :  { %13 = vsyncpa [#allocation4], 0  ;;  %s514_s0 = inlined_call_operand.hbm [shape: f32[8,16], index: 0, kind: input, shape index: {}]   ;;  %s515_s1 = inlined_call_operand.hbm [shape: bf16[16,128], index: 1, kind: input, shape index: {}]   ;;  %s516_s2 = inlined_call_operand.vmem [shape: f32[1,128], index: 2, kind: input, shape index: {}]   ;;  %s517_s3 = inlined_call_operand.hbm [shape: bf16[128,128], index: 3, kind: input, shape index: {}]   ;;  %s518_s4 = inlined_call_operand.vmem [shape: f32[1,128], index: 4, kind: input, shape index: {}]   ;;  %s519_s5 = inlined_call_operand.vmem [shape: f32[1,128], index: 5, kind: input, shape index: {}]   ;;  %s520_s6 = inlined_call_operand.<no memory space> [shape: f32[1], index: 6, kind: input, shape index: {}]   ;;  %s521_s7 = inlined_call_operand.vmem [shape: f32[8,1], index: 7, kind: output, shape index: {}]  }
   0x1   :  { %14 = vsyncpa [#allocation6], 0  ;;  %s410_s24 = smov [#allocation5]   ;;  %s340_s28 = scalar_lea.hbm %s515_s1, 128 }
   0x2   :  { %s30_s25 = sshll.u32 %s410_s24, 4  ;;  %p341_p0 = scmp.ne.s32.totalorder %s515_s1, %s340_s28  ;;  %s31_s25 = int_to_ptr.vmem [resolvable:$true] %s30_s25 }
   0x3   :  { %p344_p1 = scmp.lt.u32.totalorder %s340_s28, %s515_s1 }
   0x5   :  { %p346_p2 = pnand %p344_p1, %p341_p0 }
   0x7   :  { %349 = shalt.err (!%p346_p2)
}
   0x8   :  { %s350_s10 = scalar_lea.vmem %s31_s25, 128  ;;  %p355_p4 = scmp.lt.s32.totalorder %s31_s25, %s31_s25 }
   0x9   :  { %p351_p3 = scmp.ne.s32.totalorder %s31_s25, %s350_s10  ;;  %p356_p5 = scmp.lt.s32.totalorder %s350_s10, %s350_s10 }
   0xb   :  { %p357_p6 = por %p356_p5, %p355_p4 }
   0xd   :  { %p358_p7 = pnand %p357_p6, %p351_p3 }
   0xf   :  { %361 = shalt.err (!%p358_p7)
}
  0x10   :  { %s411_s11 = smov 64   ;;  %s412_s12 = smov 4  }
  0x11   :  { %36 = dma.hbm_to_vmem [thread:$0]  %s515_s1, 128, %s31_s25, [#allocation6], %s411_s11, %s411_s11, %s412_s12  }
  0x12   :  { %s413_s15 = smov [#allocation3]   ;;  %s414_s17 = smov [#allocation7]  }
  0x13   :  { %s21_s16 = sshll.u32 %s413_s15, 4  ;;  %s44_s18 = sshll.u32 %s414_s17, 4  ;;  %s22_s16 = int_to_ptr.vmem [resolvable:$true] %s21_s16  ;;  %s45_s18 = int_to_ptr.vmem [resolvable:$true] %s44_s18 }
  0x14   :  { %s362_s21 = scalar_lea.hbm %s514_s0, 128 }
  0x15   :  { %p363_p8 = scmp.ne.s32.totalorder %s514_s0, %s362_s21  ;;  %p366_p9 = scmp.lt.u32.totalorder %s362_s21, %s514_s0 }
  0x17   :  { %p368_p10 = pnand %p366_p9, %p363_p8 }
  0x19   :  { %371 = shalt.err (!%p368_p10)
}
  0x1a   :  { %s372_s1 = scalar_lea.vmem %s22_s16, 128  ;;  %p377_p12 = scmp.lt.s32.totalorder %s22_s16, %s22_s16 }
  0x1b   :  { %p373_p11 = scmp.ne.s32.totalorder %s22_s16, %s372_s1  ;;  %p378_p13 = scmp.lt.s32.totalorder %s372_s1, %s372_s1 }
  0x1d   :  { %p379_p0 = por %p378_p13, %p377_p12 }
  0x1f   :  { %p380_p1 = pnand %p379_p0, %p373_p11 }
  0x21   :  { %383 = shalt.err (!%p380_p1)
}
  0x22   :  { %24 = dma.hbm_to_vmem [thread:$0]  %s514_s0, 128, %s22_s16, [#allocation4]  }
  0x23   :  { %s384_s30 = scalar_lea.hbm %s517_s3, 1024 }
  0x24   :  { %p385_p2 = scmp.ne.s32.totalorder %s517_s3, %s384_s30  ;;  %p388_p3 = scmp.lt.u32.totalorder %s384_s30, %s517_s3 }
  0x26   :  { %p390_p4 = pnand %p388_p3, %p385_p2 }
  0x28   :  { %393 = shalt.err (!%p390_p4)
}
  0x29   :  { %s394_s14 = scalar_lea.vmem %s45_s18, 1024  ;;  %p399_p6 = scmp.lt.s32.totalorder %s45_s18, %s45_s18 }
  0x2a   :  { %p395_p5 = scmp.ne.s32.totalorder %s45_s18, %s394_s14  ;;  %p400_p7 = scmp.lt.s32.totalorder %s394_s14, %s394_s14 }
  0x2c   :  { %p401_p8 = por %p400_p7, %p399_p6 }
  0x2e   :  { %p402_p9 = pnand %p401_p8, %p395_p5 }
  0x30   :  { %405 = shalt.err (!%p402_p9)
}
  0x31   :  { %50 = dma.hbm_to_vmem [thread:$0]  %s517_s3, 1024, %s45_s18, [#allocation6], %s411_s11, %s411_s11, %s412_s12  }
  0x32   :  { %406 = dma.done.wait [#allocation4], 128  }
  0x33   :  { %407 = vsyncadd [#allocation4], 4294967168 }
  0x34   :  { %408 = dma.done.wait [#allocation6], 1152  }
  0x35   :  { %409 = vsyncadd [#allocation6], 4294966144  ;;  %v415_v0 = vmov 0.0   ;;  %vm416_vm0 = vmmov 0   ;;  %v327_v1 = vld [vmem:[#allocation5] sm:$0xff]   ;;  %v67_v2 = vld [vmem:[#allocation3] sm:$0xff]  ;;  %v253_v29 = vstv %s520_s6 }
  0x36   :  { %294 = vmatprep.subr.bf16.mxu0 %v415_v0  ;;  %296 = vmatprep.mubr.msk.bf16.mxu0 %vm416_vm0, %v415_v0  ;;  %v68_v3 = vpack.c.bf16 %v67_v2, %v67_v2  ;;  %vm84_vm1 = vcmask 130048   ;;  %v328_v4 = vld [vmem:[#allocation7] sm:$0xff]   ;;  %v329_v5 = vld [vmem:[#allocation7 + $0x8] sm:$0xff]   ;;  %v330_v6 = vld [vmem:[#allocation7 + $0x10] sm:$0xff]   ;;  %vm261_vm2 = vcmask 7168  }
  0x37   :  { %300 = vmatprep.subr.bf16.mxu1 %v415_v0  ;;  %316 = vmatprep.mubr.msk.bf16.mxu1 %vm416_vm0, %v415_v0  ;;  %v331_v7 = vld [vmem:[#allocation7 + $0x18] sm:$0xff]   ;;  %v332_v8 = vld [vmem:[#allocation7 + $0x20] sm:$0xff]   ;;  %v333_v9 = vld [vmem:[#allocation7 + $0x28] sm:$0xff]  }
  0x38   :  { %295 = vmatpush3.bf16.msra.mxu0 %v327_v1  ;;  %301 = vmatpush3.bf16.msra.mxu1 %v328_v4  ;;  %v334_v10 = vld [vmem:[#allocation7 + $0x30] sm:$0xff]   ;;  %v335_v11 = vld [vmem:[#allocation7 + $0x38] sm:$0xff]  }
  0x39   :  { %302 = vmatprep.subr.bf16.mxu1 %v415_v0  ;;  %v269_v12 = vld [vmem:[%s516_s2] ss:$0 sm:$0xff] }
  0x3a   :  { %v272_v20 = vld [vmem:[%s518_s4] ss:$0 sm:$0xff] }
  0x3b   :  { %297 = vmatmul.mubr.msk.bf16.vlgmr.msra.gmra.mrb[0].mxu0 %vm84_vm1, %v68_v3  ;;  %v281_v25 = vld [vmem:[%s519_s5] ss:$0 sm:$0xff] }
  0x3c   :  { %303 = vmatpush3.bf16.msra.mxu1 %v329_v5 }
  0x3d   :  { %304 = vmatprep.subr.bf16.mxu1 %v415_v0 }
  0x40   :  { %305 = vmatpush3.bf16.msra.mxu1 %v330_v6 }
  0x41   :  { %306 = vmatprep.subr.bf16.mxu1 %v415_v0 }
  0x44   :  { %307 = vmatpush3.bf16.msra.mxu1 %v331_v7 }
  0x45   :  { %308 = vmatprep.subr.bf16.mxu1 %v415_v0 }
  0x48   :  { %309 = vmatpush3.bf16.msra.mxu1 %v332_v8 }
  0x49   :  { %310 = vmatprep.subr.bf16.mxu1 %v415_v0 }
  0x4c   :  { %311 = vmatpush3.bf16.msra.mxu1 %v333_v9 }
  0x4d   :  { %312 = vmatprep.subr.bf16.mxu1 %v415_v0 }
  0x50   :  { %313 = vmatpush3.bf16.msra.mxu1 %v334_v10 }
  0x51   :  { %314 = vmatprep.subr.bf16.mxu1 %v415_v0 }
  0x54   :  { %315 = vmatpush3.bf16.msra.mxu1 %v335_v11 }
 0x10e   :  { %v122_v13 = vpop.f32.mrb[0].mxu0 }
 0x10f   :  { %v123_v14 = vadd.f32 %v269_v12, %v122_v13  ;;  %v298_v15 = vpop.f32.mrb[1].mxu0 }
 0x110   :  { %v125_v16 = vpop.f32.mrb[2].mxu0 }
 0x111   :  { %v128_v17 = vmax.f32 %v123_v14, 0.0  ;;  %v299_v18 = vpop.f32.mrb[3].mxu0 }
 0x113   :  { %v129_v19 = vpack.c.bf16 %v128_v17, %v128_v17 }
 0x115   :  { %317 = vmatmul.mubr.bf16.vlgmr.msra.gmra.mrb[0].mxu1 %v129_v19 }
 0x1e8   :  { %v235_v21 = vpop.f32.mrb[0].mxu1 }
 0x1e9   :  { %v236_v22 = vadd.f32 %v272_v20, %v235_v21  ;;  %v318_v23 = vpop.f32.mrb[1].mxu1 }
 0x1ea   :  { %v238_v24 = vpop.f32.mrb[2].mxu1 }
 0x1eb   :  { %v241_v26 = vmax.f32 %v236_v22, 0.0  ;;  %v319_v27 = vpop.f32.mrb[3].mxu1 }
 0x1ed   :  { %v249_v28 = vmul.f32 %v281_v25, %v241_v26 }
 0x1ef   :  { %250 = vadd.xlane.f32.xlu0 %v249_v28 }
 0x27c   :  { %v251_v30 = vpop.xlane.xlu0 %250 }
 0x27d   :  { %v254_v31 = vadd.f32 %v253_v29, %v251_v30 }
 0x27f   :  { %v282_v32 = vmul.f32 -1.442695, %v254_v31 }
 0x281   :  { %336 = vpow2.f32 %v282_v32 }
 0x28b   :  { %v337_v33 = vpop.eup %336 }
 0x28c   :  { %v258_v34 = vadd.f32 1.0, %v337_v33 }
 0x28e   :  { %338 = vrcp.f32 %v258_v34 }
 0x298   :  { %v339_v35 = vpop.eup %338 }
 0x299   :  { %262 = vst.msk [vmem:[%s521_s7] sm:$0xff] %vm261_vm2, %v339_v35 }
 0x29a   :  { %267 = vsyncpa [#allocation4], 1 }
 0x29b   :  { %268 = vsyncpa [#allocation6], 1 }

</bundles_post_ra>
